<compile_context>
chip_gen: v7x
topology: tpu7x:2x2x1
jax: 0.10.0
libtpu: 0.0.40
codegen_flags: <defaults>
</compile_context>

<pallas_src>
import jax
import jax.numpy as jnp
from jax import lax
from jax.experimental import pallas as pl
from jax.experimental.pallas import tpu as pltpu


_OUT_LANES = 128  # lane-dense slab width for params / output (sliced in wrapper)


# ---------------------------------------------------------------------------
# Fused Pallas kernel (factory closes over static shapes / slab offsets)
# ---------------------------------------------------------------------------
def make_fused_gnn_kernel(num_features, hidden, heads, offs):
    hc = heads * hidden
    c = hidden

    def kernel(x_ref, adjb_ref, w_ref, b_ref, out_ref):
        """x_ref    : [N, F]      f32   node features
           adjb_ref : [N, N]      bf16  additive mask: 0 iff edge j->i (+self), else -1e30
           w_ref    : [128, 128]  bf16  packed weight slab (static row offsets `offs`)
           b_ref    : [8, 128]    f32   packed bias slab (rows 0/1/2 = b1/b2/b_final)
           out_ref  : [N, 128]    f32   lane-padded output (first F cols valid)
        """
        f32 = jnp.float32
        bf16 = jnp.bfloat16

        # Additive adjacency mask loaded ONCE, shared by both GAT layers.
        adj_bias = adjb_ref[...].astype(f32)                          # [N, N]

        def gat_layer(h_in_bf, w, asrc, adst, bias, n_heads, ch, relu):
            # Linear transform for all heads at once (MXU, bf16 ops, f32 acc).
            h_all = jnp.dot(h_in_bf, w, preferred_element_type=f32)   # [N, H*C]
            h_bf = h_all.astype(bf16)

            # Attention scores for ALL heads, lane-major [H, N] on the MXU
            # (same block-diag packing for src and dst -> no transposes, no
            # per-head column slicing).
            src_rows = lax.dot_general(asrc, h_bf, (((1,), (1,)), ((), ())),
                                       preferred_element_type=f32)    # [H, N]
            dst_rows = lax.dot_general(adst, h_bf, (((1,), (1,)), ((), ())),
                                       preferred_element_type=f32)    # [H, N]

            # Batched masked softmax over all heads: logits[h, i, j] = dst[h,i] + src[h,j]
            logits = dst_rows[:, :, None] + src_rows[:, None, :]       # [H, N, N]
            logits = jnp.where(logits > 0, logits, 0.2 * logits)       # LeakyReLU(0.2)
            logits = logits + adj_bias[None, :, :]                     # additive mask
            m = jnp.max(logits, axis=-1, keepdims=True)
            p = jnp.exp(logits - m)
            denom = jnp.sum(p, axis=-1, keepdims=True)
            alpha = (p * pl.reciprocal(denom, approx=True)).astype(bf16)  # [H, N, N]

            # Per-head neighbour aggregation (static slices of alpha, MXU dots).
            parts = []
            for hd in range(n_heads):
                agg = jnp.dot(alpha[hd], h_bf[:, hd * ch:(hd + 1) * ch],
                              preferred_element_type=f32)              # [N, C]
                agg = agg + bias[:, hd * ch:(hd + 1) * ch]
                if relu:
                    agg = jnp.maximum(agg, 0.0)
                parts.append(agg.astype(bf16))
            return parts[0] if n_heads == 1 else jnp.concatenate(parts, axis=-1)

        x_bf = x_ref[...].astype(bf16)

        # ---- GATConv 1 (heads, concat) + ReLU ----
        w1 = w_ref[offs["w1"]:offs["w1"] + num_features, 0:hc]         # [F, H*C]
        asrc1 = w_ref[offs["asrc1"]:offs["asrc1"] + heads, 0:hc]       # [H, H*C]
        adst1 = w_ref[offs["adst1"]:offs["adst1"] + heads, 0:hc]       # [H, H*C]
        b1 = b_ref[0:1, 0:hc]                                          # [1, H*C]
        h1 = gat_layer(x_bf, w1, asrc1, adst1, b1, heads, c, relu=True)  # [N, H*C] bf16

        # TODO(synk): F.dropout(p=0.2) is identity in eval/inference mode; not applied.

        # ---- GATConv 2 (1 head) ----
        w2 = w_ref[offs["w2"]:offs["w2"] + hc, 0:c]                    # [H*C, C]
        asrc2 = w_ref[offs["asrc2"]:offs["asrc2"] + 1, 0:c]            # [1, C]
        adst2 = w_ref[offs["adst2"]:offs["adst2"] + 1, 0:c]            # [1, C]
        b2 = b_ref[1:2, 0:c]                                           # [1, C]
        h2 = gat_layer(h1, w2, asrc2, adst2, b2, 1, c, relu=False)     # [N, C] bf16

        # ---- Final Linear into a lane-dense [N, 128] slab (unmasked stores) ----
        wf = w_ref[offs["wf"]:offs["wf"] + c, :]                       # [C, 128]
        bf_row = b_ref[2:3, :]                                         # [1, 128]
        out_ref[...] = jnp.dot(h2, wf, preferred_element_type=f32) + bf_row

    return kernel


# ---------------------------------------------------------------------------
# Wrappers
# ---------------------------------------------------------------------------
def _block_diag_rows(att):
    """[H, C] -> [H, H*C]: row h holds att[h] at columns h*C:(h+1)*C."""
    h, c = att.shape
    eye = jnp.eye(h, dtype=att.dtype)
    return (eye[:, :, None] * att[:, None, :]).reshape(h, h * c)


def _roundup(n, m):
    return ((n + m - 1) // m) * m


def prepare_inference_params(params, num_features, hidden, heads):
    """Pack all parameters into one bf16 weight slab + one f32 bias slab (done once)."""
    hc = heads * hidden
    blocks = {
        "w1": params["w1"],                              # [F, H*C]
        "asrc1": _block_diag_rows(params["att_src1"]),   # [H, H*C]
        "adst1": _block_diag_rows(params["att_dst1"]),   # [H, H*C]
        "w2": params["w2"],                              # [H*C, C]
        "asrc2": params["att_src2"],                     # [1, C]
        "adst2": params["att_dst2"],                     # [1, C]
        "wf": params["w_final"],                         # [C, F]
    }
    offs, rows = {}, 0
    for name, arr in blocks.items():
        offs[name] = rows
        rows += _roundup(arr.shape[0], 8)
    total_rows = _roundup(rows, 16)                      # bf16 sublane packing

    wslab = jnp.zeros((total_rows, _OUT_LANES), jnp.float32)
    for name, arr in blocks.items():
        r, cc = arr.shape
        wslab = wslab.at[offs[name]:offs[name] + r, :cc].set(arr)
    wslab = wslab.astype(jnp.bfloat16)

    bslab = jnp.zeros((8, _OUT_LANES), jnp.float32)
    bslab = bslab.at[0, :hc].set(params["bias1"][0])
    bslab = bslab.at[1, :hidden].set(params["bias2"][0])
    bslab = bslab.at[2, :num_features].set(params["b_final"][0])

    return {"wslab": wslab, "bslab": bslab, "offs": offs}


def gnn_recommender_forward(kparams, x, adj_bias, *, heads, hidden, num_features):
    """Forward pass matching GNNRecommender.forward (edge_attr=None, eval mode)."""
    n = x.shape[0]
    kernel = make_fused_gnn_kernel(num_features, hidden, heads, kparams["offs"])
    vmem = pl.BlockSpec(memory_space=pltpu.MemorySpace.VMEM)
    out_padded = pl.pallas_call(
        kernel,
        out_shape=jax.ShapeDtypeStruct((n, _OUT_LANES), jnp.float32),
        in_specs=[vmem] * 4,
        out_specs=vmem,
        compiler_params=pltpu.CompilerParams(vmem_limit_bytes=32 * 1024 * 1024),
    )(x, adj_bias, kparams["wslab"], kparams["bslab"])
    return out_padded[:, :num_features]


# ---------------------------------------------------------------------------
# Deterministic parameter / input construction
# ---------------------------------------------------------------------------
def init_params(key, num_features, hidden, heads):
    ks = jax.random.split(key, 8)
    scale = 0.1
    return {
        # GATConv 1: num_features -> hidden, heads=heads (concat)
        "w1": scale * jax.random.normal(ks[0], (num_features, heads * hidden), jnp.float32),
        "att_src1": scale * jax.random.normal(ks[1], (heads, hidden), jnp.float32),
        "att_dst1": scale * jax.random.normal(ks[2], (heads, hidden), jnp.float32),
        "bias1": jnp.zeros((1, heads * hidden), jnp.float32),
        # GATConv 2: hidden*heads -> hidden, heads=1
        "w2": scale * jax.random.normal(ks[3], (heads * hidden, hidden), jnp.float32),
        "att_src2": scale * jax.random.normal(ks[4], (1, hidden), jnp.float32),
        "att_dst2": scale * jax.random.normal(ks[5], (1, hidden), jnp.float32),
        "bias2": jnp.zeros((1, hidden), jnp.float32),
        # final Linear: hidden -> num_features (stored pre-transposed [in, out])
        "w_final": scale * jax.random.normal(ks[6], (hidden, num_features), jnp.float32),
        "b_final": scale * jax.random.normal(ks[7], (1, num_features), jnp.float32),
    }


def build_adjacency_bias(edge_index, num_nodes):
    """Additive attention mask: 0 iff edge j -> i (self-loops added, GATConv
    default), -1e30 otherwise. Stored bf16 (half the HBM traffic of f32)."""
    adj = jnp.zeros((num_nodes, num_nodes), jnp.float32)
    adj = adj.at[edge_index[1], edge_index[0]].set(1.0)
    idx = jnp.arange(num_nodes)
    adj = adj.at[idx, idx].set(1.0)
    return jnp.where(adj > 0, 0.0, -1e30).astype(jnp.bfloat16)


# ---------------------------------------------------------------------------
if __name__ == "__main__":
    NUM_NODES = 16
    NUM_FEATURES = 8
    HIDDEN = 16
    HEADS = 4
    NUM_EDGES = 32

    key = jax.random.PRNGKey(0)
    k_x, k_e, k_p = jax.random.split(key, 3)

    # node features [N, F]
    x = jax.random.normal(k_x, (NUM_NODES, NUM_FEATURES), jnp.float32)

    # deterministic edge_index [2, E]: ring graph + random extra edges
    ring_src = jnp.arange(NUM_NODES)
    ring_dst = (ring_src + 1) % NUM_NODES
    extra = jax.random.randint(k_e, (2, NUM_EDGES - NUM_NODES), 0, NUM_NODES)
    edge_index = jnp.concatenate(
        [jnp.stack([ring_src, ring_dst]), extra], axis=1).astype(jnp.int32)

    adj_bias = build_adjacency_bias(edge_index, NUM_NODES)
    params = init_params(k_p, NUM_FEATURES, HIDDEN, HEADS)
    kparams = prepare_inference_params(params, NUM_FEATURES, HIDDEN, HEADS)

    out = gnn_recommender_forward(kparams, x, adj_bias,
                                  heads=HEADS, hidden=HIDDEN,
                                  num_features=NUM_FEATURES)
    out = jax.block_until_ready(out)
    assert out.shape == (NUM_NODES, NUM_FEATURES)
    print("KERNEL_OK")
</pallas_src>

<mosaic_0001>
module attributes {stable_mosaic.version = 11 : i64} {
  func.func @kernel(%arg0: memref<16x8xf32, #tpu.memory_space<vmem>>, %arg1: memref<16x16xbf16, #tpu.memory_space<vmem>>, %arg2: memref<128x128xbf16, #tpu.memory_space<vmem>>, %arg3: memref<8x128xf32, #tpu.memory_space<vmem>>, %arg4: memref<16x128xf32, #tpu.memory_space<vmem>>) attributes {dimension_semantics = [], scalar_prefetch = 0 : i64, scratch_operands = 0 : i64, tpu.core_type = #tpu.core_type<tc>} {
    %c0 = arith.constant 0 : index
    %c0_0 = arith.constant 0 : index
    %0 = vector.load %arg1[%c0, %c0_0] : memref<16x16xbf16, #tpu.memory_space<vmem>>, vector<16x16xbf16>
    %1 = arith.extf %0 : vector<16x16xbf16> to vector<16x16xf32>
    %c0_1 = arith.constant 0 : index
    %c0_2 = arith.constant 0 : index
    %2 = vector.load %arg0[%c0_1, %c0_2] : memref<16x8xf32, #tpu.memory_space<vmem>>, vector<16x8xf32>
    %3 = arith.truncf %2 : vector<16x8xf32> to vector<16x8xbf16>
    %c0_3 = arith.constant 0 : index
    %c0_4 = arith.constant 0 : index
    %4 = vector.load %arg2[%c0_3, %c0_4] : memref<128x128xbf16, #tpu.memory_space<vmem>>, vector<8x64xbf16>
    %c8 = arith.constant 8 : index
    %c0_5 = arith.constant 0 : index
    %5 = vector.load %arg2[%c8, %c0_5] : memref<128x128xbf16, #tpu.memory_space<vmem>>, vector<4x64xbf16>
    %c16 = arith.constant 16 : index
    %c0_6 = arith.constant 0 : index
    %6 = vector.load %arg2[%c16, %c0_6] : memref<128x128xbf16, #tpu.memory_space<vmem>>, vector<4x64xbf16>
    %c0_7 = arith.constant 0 : index
    %c0_8 = arith.constant 0 : index
    %7 = vector.load %arg3[%c0_7, %c0_8] : memref<8x128xf32, #tpu.memory_space<vmem>>, vector<1x64xf32>
    %cst = arith.constant dense<0.000000e+00> : vector<16x64xf32>
    %8 = tpu.matmul %3, %4, %cst {dimension_numbers = #tpu.dot_dimension_numbers<[1], [0], [0], [1], [0, 0, 1, 1], [], []>} : vector<16x8xbf16>, vector<8x64xbf16>, vector<16x64xf32> -> vector<16x64xf32>
    %9 = arith.truncf %8 : vector<16x64xf32> to vector<16x64xbf16>
    %cst_9 = arith.constant dense<0.000000e+00> : vector<4x16xf32>
    %10 = tpu.matmul %5, %9, %cst_9 {dimension_numbers = #tpu.dot_dimension_numbers<[1], [1], [0], [0], [0, 0, 1, 0], [], []>} : vector<4x64xbf16>, vector<16x64xbf16>, vector<4x16xf32> -> vector<4x16xf32>
    %cst_10 = arith.constant dense<0.000000e+00> : vector<4x16xf32>
    %11 = tpu.matmul %6, %9, %cst_10 {dimension_numbers = #tpu.dot_dimension_numbers<[1], [1], [0], [0], [0, 0, 1, 0], [], []>} : vector<4x64xbf16>, vector<16x64xbf16>, vector<4x16xf32> -> vector<4x16xf32>
    %12 = vector.shape_cast %11 : vector<4x16xf32> to vector<4x16x1xf32>
    %13 = vector.shape_cast %10 : vector<4x16xf32> to vector<4x1x16xf32>
    %14 = vector.broadcast %12 : vector<4x16x1xf32> to vector<4x16x16xf32>
    %15 = vector.broadcast %13 : vector<4x1x16xf32> to vector<4x16x16xf32>
    %16 = arith.addf %14, %15 : vector<4x16x16xf32>
    %cst_11 = arith.constant 0.000000e+00 : f32
    %17 = vector.broadcast %cst_11 : f32 to vector<4x16x16xf32>
    %18 = arith.cmpf ogt, %16, %17 : vector<4x16x16xf32>
    %cst_12 = arith.constant 2.000000e-01 : f32
    %19 = vector.broadcast %cst_12 : f32 to vector<4x16x16xf32>
    %20 = arith.mulf %19, %16 : vector<4x16x16xf32>
    %21 = arith.select %18, %16, %20 : vector<4x16x16xi1>, vector<4x16x16xf32>
    %22 = vector.shape_cast %1 : vector<16x16xf32> to vector<1x16x16xf32>
    %23 = vector.broadcast %22 : vector<1x16x16xf32> to vector<4x16x16xf32>
    %24 = arith.addf %21, %23 : vector<4x16x16xf32>
    %cst_13 = arith.constant dense<0xFF800000> : vector<4x16xf32>
    %25 = vector.multi_reduction <maximumf>, %24, %cst_13 [2] : vector<4x16x16xf32> to vector<4x16xf32>
    %26 = vector.shape_cast %25 : vector<4x16xf32> to vector<4x16x1xf32>
    %27 = vector.broadcast %26 : vector<4x16x1xf32> to vector<4x16x16xf32>
    %28 = arith.subf %24, %27 : vector<4x16x16xf32>
    %29 = math.exp %28 : vector<4x16x16xf32>
    %cst_14 = arith.constant dense<0.000000e+00> : vector<4x16xf32>
    %30 = vector.multi_reduction <add>, %29, %cst_14 [2] : vector<4x16x16xf32> to vector<4x16xf32>
    %31 = vector.shape_cast %30 : vector<4x16xf32> to vector<4x16x1xf32>
    %32 = tpu.reciprocal %31 {approx = true} : vector<4x16x1xf32> -> vector<4x16x1xf32>
    %33 = vector.broadcast %32 : vector<4x16x1xf32> to vector<4x16x16xf32>
    %34 = arith.mulf %29, %33 : vector<4x16x16xf32>
    %35 = arith.truncf %34 : vector<4x16x16xf32> to vector<4x16x16xbf16>
    %36 = vector.extract_strided_slice %35 {offsets = [0, 0, 0], sizes = [1, 16, 16], strides = [1, 1, 1]} : vector<4x16x16xbf16> to vector<1x16x16xbf16>
    %37 = vector.shape_cast %36 : vector<1x16x16xbf16> to vector<16x16xbf16>
    %38 = vector.extract_strided_slice %9 {offsets = [0, 0], sizes = [16, 16], strides = [1, 1]} : vector<16x64xbf16> to vector<16x16xbf16>
    %cst_15 = arith.constant dense<0.000000e+00> : vector<16x16xf32>
    %39 = tpu.matmul %37, %38, %cst_15 {dimension_numbers = #tpu.dot_dimension_numbers<[1], [0], [0], [1], [0, 0, 1, 1], [], []>} : vector<16x16xbf16>, vector<16x16xbf16>, vector<16x16xf32> -> vector<16x16xf32>
    %40 = vector.extract_strided_slice %7 {offsets = [0, 0], sizes = [1, 16], strides = [1, 1]} : vector<1x64xf32> to vector<1x16xf32>
    %41 = vector.broadcast %40 : vector<1x16xf32> to vector<16x16xf32>
    %42 = arith.addf %39, %41 : vector<16x16xf32>
    %cst_16 = arith.constant 0.000000e+00 : f32
    %43 = vector.broadcast %cst_16 : f32 to vector<16x16xf32>
    %44 = arith.maximumf %42, %43 : vector<16x16xf32>
    %45 = arith.truncf %44 : vector<16x16xf32> to vector<16x16xbf16>
    %46 = vector.extract_strided_slice %35 {offsets = [1, 0, 0], sizes = [1, 16, 16], strides = [1, 1, 1]} : vector<4x16x16xbf16> to vector<1x16x16xbf16>
    %47 = vector.shape_cast %46 : vector<1x16x16xbf16> to vector<16x16xbf16>
    %48 = vector.extract_strided_slice %9 {offsets = [0, 16], sizes = [16, 16], strides = [1, 1]} : vector<16x64xbf16> to vector<16x16xbf16>
    %cst_17 = arith.constant dense<0.000000e+00> : vector<16x16xf32>
    %49 = tpu.matmul %47, %48, %cst_17 {dimension_numbers = #tpu.dot_dimension_numbers<[1], [0], [0], [1], [0, 0, 1, 1], [], []>} : vector<16x16xbf16>, vector<16x16xbf16>, vector<16x16xf32> -> vector<16x16xf32>
    %50 = vector.extract_strided_slice %7 {offsets = [0, 16], sizes = [1, 16], strides = [1, 1]} : vector<1x64xf32> to vector<1x16xf32>
    %51 = vector.broadcast %50 : vector<1x16xf32> to vector<16x16xf32>
    %52 = arith.addf %49, %51 : vector<16x16xf32>
    %cst_18 = arith.constant 0.000000e+00 : f32
    %53 = vector.broadcast %cst_18 : f32 to vector<16x16xf32>
    %54 = arith.maximumf %52, %53 : vector<16x16xf32>
    %55 = arith.truncf %54 : vector<16x16xf32> to vector<16x16xbf16>
    %56 = vector.extract_strided_slice %35 {offsets = [2, 0, 0], sizes = [1, 16, 16], strides = [1, 1, 1]} : vector<4x16x16xbf16> to vector<1x16x16xbf16>
    %57 = vector.shape_cast %56 : vector<1x16x16xbf16> to vector<16x16xbf16>
    %58 = vector.extract_strided_slice %9 {offsets = [0, 32], sizes = [16, 16], strides = [1, 1]} : vector<16x64xbf16> to vector<16x16xbf16>
    %cst_19 = arith.constant dense<0.000000e+00> : vector<16x16xf32>
    %59 = tpu.matmul %57, %58, %cst_19 {dimension_numbers = #tpu.dot_dimension_numbers<[1], [0], [0], [1], [0, 0, 1, 1], [], []>} : vector<16x16xbf16>, vector<16x16xbf16>, vector<16x16xf32> -> vector<16x16xf32>
    %60 = vector.extract_strided_slice %7 {offsets = [0, 32], sizes = [1, 16], strides = [1, 1]} : vector<1x64xf32> to vector<1x16xf32>
    %61 = vector.broadcast %60 : vector<1x16xf32> to vector<16x16xf32>
    %62 = arith.addf %59, %61 : vector<16x16xf32>
    %cst_20 = arith.constant 0.000000e+00 : f32
    %63 = vector.broadcast %cst_20 : f32 to vector<16x16xf32>
    %64 = arith.maximumf %62, %63 : vector<16x16xf32>
    %65 = arith.truncf %64 : vector<16x16xf32> to vector<16x16xbf16>
    %66 = vector.extract_strided_slice %35 {offsets = [3, 0, 0], sizes = [1, 16, 16], strides = [1, 1, 1]} : vector<4x16x16xbf16> to vector<1x16x16xbf16>
    %67 = vector.shape_cast %66 : vector<1x16x16xbf16> to vector<16x16xbf16>
    %68 = vector.extract_strided_slice %9 {offsets = [0, 48], sizes = [16, 16], strides = [1, 1]} : vector<16x64xbf16> to vector<16x16xbf16>
    %cst_21 = arith.constant dense<0.000000e+00> : vector<16x16xf32>
    %69 = tpu.matmul %67, %68, %cst_21 {dimension_numbers = #tpu.dot_dimension_numbers<[1], [0], [0], [1], [0, 0, 1, 1], [], []>} : vector<16x16xbf16>, vector<16x16xbf16>, vector<16x16xf32> -> vector<16x16xf32>
    %70 = vector.extract_strided_slice %7 {offsets = [0, 48], sizes = [1, 16], strides = [1, 1]} : vector<1x64xf32> to vector<1x16xf32>
    %71 = vector.broadcast %70 : vector<1x16xf32> to vector<16x16xf32>
    %72 = arith.addf %69, %71 : vector<16x16xf32>
    %cst_22 = arith.constant 0.000000e+00 : f32
    %73 = vector.broadcast %cst_22 : f32 to vector<16x16xf32>
    %74 = arith.maximumf %72, %73 : vector<16x16xf32>
    %75 = arith.truncf %74 : vector<16x16xf32> to vector<16x16xbf16>
    %76 = tpu.concatenate %45, %55, %65, %75 in 1 : vector<16x16xbf16>, vector<16x16xbf16>, vector<16x16xbf16>, vector<16x16xbf16> -> vector<16x64xbf16>
    %c24 = arith.constant 24 : index
    %c0_23 = arith.constant 0 : index
    %77 = vector.load %arg2[%c24, %c0_23] : memref<128x128xbf16, #tpu.memory_space<vmem>>, vector<64x16xbf16>
    %c88 = arith.constant 88 : index
    %c0_24 = arith.constant 0 : index
    %78 = vector.load %arg2[%c88, %c0_24] : memref<128x128xbf16, #tpu.memory_space<vmem>>, vector<1x16xbf16>
    %c96 = arith.constant 96 : index
    %c0_25 = arith.constant 0 : index
    %79 = vector.load %arg2[%c96, %c0_25] : memref<128x128xbf16, #tpu.memory_space<vmem>>, vector<1x16xbf16>
    %c1 = arith.constant 1 : index
    %c0_26 = arith.constant 0 : index
    %80 = vector.load %arg3[%c1, %c0_26] : memref<8x128xf32, #tpu.memory_space<vmem>>, vector<1x16xf32>
    %cst_27 = arith.constant dense<0.000000e+00> : vector<16x16xf32>
    %81 = tpu.matmul %76, %77, %cst_27 {dimension_numbers = #tpu.dot_dimension_numbers<[1], [0], [0], [1], [0, 0, 1, 1], [], []>} : vector<16x64xbf16>, vector<64x16xbf16>, vector<16x16xf32> -> vector<16x16xf32>
    %82 = arith.truncf %81 : vector<16x16xf32> to vector<16x16xbf16>
    %cst_28 = arith.constant dense<0.000000e+00> : vector<1x16xf32>
    %83 = tpu.matmul %78, %82, %cst_28 {dimension_numbers = #tpu.dot_dimension_numbers<[1], [1], [0], [0], [0, 0, 1, 0], [], []>} : vector<1x16xbf16>, vector<16x16xbf16>, vector<1x16xf32> -> vector<1x16xf32>
    %cst_29 = arith.constant dense<0.000000e+00> : vector<1x16xf32>
    %84 = tpu.matmul %79, %82, %cst_29 {dimension_numbers = #tpu.dot_dimension_numbers<[1], [1], [0], [0], [0, 0, 1, 0], [], []>} : vector<1x16xbf16>, vector<16x16xbf16>, vector<1x16xf32> -> vector<1x16xf32>
    %85 = vector.shape_cast %84 : vector<1x16xf32> to vector<1x16x1xf32>
    %86 = vector.shape_cast %83 : vector<1x16xf32> to vector<1x1x16xf32>
    %87 = vector.broadcast %85 : vector<1x16x1xf32> to vector<1x16x16xf32>
    %88 = vector.broadcast %86 : vector<1x1x16xf32> to vector<1x16x16xf32>
    %89 = arith.addf %87, %88 : vector<1x16x16xf32>
    %cst_30 = arith.constant 0.000000e+00 : f32
    %90 = vector.broadcast %cst_30 : f32 to vector<1x16x16xf32>
    %91 = arith.cmpf ogt, %89, %90 : vector<1x16x16xf32>
    %cst_31 = arith.constant 2.000000e-01 : f32
    %92 = vector.broadcast %cst_31 : f32 to vector<1x16x16xf32>
    %93 = arith.mulf %92, %89 : vector<1x16x16xf32>
    %94 = arith.select %91, %89, %93 : vector<1x16x16xi1>, vector<1x16x16xf32>
    %95 = vector.shape_cast %1 : vector<16x16xf32> to vector<1x16x16xf32>
    %96 = arith.addf %94, %95 : vector<1x16x16xf32>
    %cst_32 = arith.constant dense<0xFF800000> : vector<1x16xf32>
    %97 = vector.multi_reduction <maximumf>, %96, %cst_32 [2] : vector<1x16x16xf32> to vector<1x16xf32>
    %98 = vector.shape_cast %97 : vector<1x16xf32> to vector<1x16x1xf32>
    %99 = vector.broadcast %98 : vector<1x16x1xf32> to vector<1x16x16xf32>
    %100 = arith.subf %96, %99 : vector<1x16x16xf32>
    %101 = math.exp %100 : vector<1x16x16xf32>
    %cst_33 = arith.constant dense<0.000000e+00> : vector<1x16xf32>
    %102 = vector.multi_reduction <add>, %101, %cst_33 [2] : vector<1x16x16xf32> to vector<1x16xf32>
    %103 = vector.shape_cast %102 : vector<1x16xf32> to vector<1x16x1xf32>
    %104 = tpu.reciprocal %103 {approx = true} : vector<1x16x1xf32> -> vector<1x16x1xf32>
    %105 = vector.broadcast %104 : vector<1x16x1xf32> to vector<1x16x16xf32>
    %106 = arith.mulf %101, %105 : vector<1x16x16xf32>
    %107 = arith.truncf %106 : vector<1x16x16xf32> to vector<1x16x16xbf16>
    %108 = vector.shape_cast %107 : vector<1x16x16xbf16> to vector<16x16xbf16>
    %cst_34 = arith.constant dense<0.000000e+00> : vector<16x16xf32>
    %109 = tpu.matmul %108, %82, %cst_34 {dimension_numbers = #tpu.dot_dimension_numbers<[1], [0], [0], [1], [0, 0, 1, 1], [], []>} : vector<16x16xbf16>, vector<16x16xbf16>, vector<16x16xf32> -> vector<16x16xf32>
    %110 = vector.broadcast %80 : vector<1x16xf32> to vector<16x16xf32>
    %111 = arith.addf %109, %110 : vector<16x16xf32>
    %112 = arith.truncf %111 : vector<16x16xf32> to vector<16x16xbf16>
    %c104 = arith.constant 104 : index
    %c0_35 = arith.constant 0 : index
    %113 = vector.load %arg2[%c104, %c0_35] : memref<128x128xbf16, #tpu.memory_space<vmem>>, vector<16x128xbf16>
    %c2 = arith.constant 2 : index
    %c0_36 = arith.constant 0 : index
    %114 = vector.load %arg3[%c2, %c0_36] : memref<8x128xf32, #tpu.memory_space<vmem>>, vector<1x128xf32>
    %cst_37 = arith.constant dense<0.000000e+00> : vector<16x128xf32>
    %115 = tpu.matmul %112, %113, %cst_37 {dimension_numbers = #tpu.dot_dimension_numbers<[1], [0], [0], [1], [0, 0, 1, 1], [], []>} : vector<16x16xbf16>, vector<16x128xbf16>, vector<16x128xf32> -> vector<16x128xf32>
    %116 = vector.broadcast %114 : vector<1x128xf32> to vector<16x128xf32>
    %117 = arith.addf %115, %116 : vector<16x128xf32>
    %c0_38 = arith.constant 0 : index
    %c0_39 = arith.constant 0 : index
    %118 = vector.load %arg4[%c0_38, %c0_39] : memref<16x128xf32, #tpu.memory_space<vmem>>, vector<16x128xf32>
    tpu.vector_store %arg4[%c0_38, %c0_39], %117 {strides = array<i32>} : memref<16x128xf32, #tpu.memory_space<vmem>>, vector<16x128xf32>,
    return
  }
}

</mosaic_0001>

<bundles_post_ra>
// kernel: tpu_custom_call.1
= control target key start
LH: loop header
LB: loop body
LE: loop exit
PB: predicated region body
PF: predicated region fallthrough
CT: control target
= control target key end

     0   :  { %9 = vsyncpa [#allocation3], 0  ;;  %s1408_s0 = inlined_call_operand.vmem [shape: f32[16,8], index: 0, kind: input, shape index: {}]   ;;  %s1409_s1 = inlined_call_operand.vmem [shape: bf16[16,16], index: 1, kind: input, shape index: {}]   ;;  %s1410_s2 = inlined_call_operand.hbm [shape: bf16[128,128], index: 2, kind: input, shape index: {}]   ;;  %s1411_s3 = inlined_call_operand.vmem [shape: f32[8,128], index: 3, kind: input, shape index: {}]   ;;  %s1412_s4 = inlined_call_operand.hbm [shape: f32[16,128], index: 4, kind: output, shape index: {}]  }
   0x1   :  { %10 = vsyncpa [#allocation4], 0  ;;  %s1214_s15 = smov [#allocation2]   ;;  %s1166_s19 = scalar_lea.hbm %s1410_s2, 1024 }
   0x2   :  { %s20_s16 = sshll.u32 %s1214_s15, 4  ;;  %p1167_p0 = scmp.ne.s32.totalorder %s1410_s2, %s1166_s19  ;;  %s21_s16 = int_to_ptr.vmem [resolvable:$true] %s20_s16 }
   0x3   :  { %p1170_p1 = scmp.lt.u32.totalorder %s1166_s19, %s1410_s2 }
   0x5   :  { %p1172_p2 = pnand %p1170_p1, %p1167_p0 }
   0x7   :  { %1175 = shalt.err (!%p1172_p2)
}
   0x8   :  { %s1176_s24 = scalar_lea.vmem %s21_s16, 1024  ;;  %p1181_p4 = scmp.lt.s32.totalorder %s21_s16, %s21_s16 }
   0x9   :  { %p1177_p3 = scmp.ne.s32.totalorder %s21_s16, %s1176_s24  ;;  %p1182_p5 = scmp.lt.s32.totalorder %s1176_s24, %s1176_s24 }
   0xb   :  { %p1183_p6 = por %p1182_p5, %p1181_p4 }
   0xd   :  { %p1184_p7 = pnand %p1183_p6, %p1177_p3 }
   0xf   :  { %1187 = shalt.err (!%p1184_p7)
}
  0x10   :  { %s1215_s25 = smov 64   ;;  %s1216_s26 = smov 4  }
  0x11   :  { %26 = dma.hbm_to_vmem [thread:$0]  %s1410_s2, 1024, %s21_s16, [#allocation3], %s1215_s25, %s1215_s25, %s1216_s26  }
  0x12   :  { %1210 = dma.done.wait [#allocation3], 1024  }
  0x13   :  { %1211 = vsyncadd [#allocation3], 4294966272  ;;  %v1217_v0 = vmov 0.0   ;;  %vm1218_vm0 = vmmov 0   ;;  %vm48_vm1 = vcmask 1043456   ;;  %v37_v2 = vld [vmem:[%s1408_s0] sm:$0xff]  ;;  %v184_v14 = vlaneseq }
  0x14   :  { %1028 = vmatprep.subr.bf16.mxu0 %v1217_v0  ;;  %1030 = vmatprep.mubr.msk.bf16.mxu0 %vm1218_vm0, %v1217_v0  ;;  %v40_v1 = vld [vmem:[#allocation2] sm:$0xf]  ;;  %v38_v3 = vld [vmem:[%s1408_s0 + $0x8] sm:$0xff]  ;;  %vm44_vm2 = vcmask 64512   ;;  %vm94_vm3 = vcmask 523264   ;;  %vm313_vm6 = vcmask 130048  }
  0x15   :  { %1034 = vmatprep.subr.bf16.mxu1 %v1217_v0  ;;  %1036 = vmatprep.mubr.msk.bf16.mxu1 %vm1218_vm0, %v1217_v0  ;;  %v50_v4 = vsel %vm48_vm1, %v40_v1, 0  ;;  %v39_v5 = vpack.c.bf16 %v38_v3, %v37_v2  ;;  %v42_v12 = vld [vmem:[#allocation2 + $0x8] sm:$0x3]  ;;  %v41_v13 = vld [vmem:[#allocation2 + $0x4] sm:$0x3]  ;;  %v185_v17 = vshrl.u32 %v184_v14, 7 }
  0x16   :  { %1029 = vmatpush3.bf16.msra.mxu0 %v50_v4  ;;  %v1219_v15 = vmov 1966171168   ;;  %v998_v42 = vld [vmem:[%s1409_s1] sm:$0xff]   ;;  %s1220_s1 = smov 112   ;;  %s1221_s7 = smov 80   ;;  %vm630_vm13 = vcmask 261120  }
  0x17   :  { %1040 = vmatprep.subr.bf16.mxu0 %v1217_v0  ;;  %v230_v16 = vunpack.c.l.s4 %v1219_v15  ;;  %v197_v19 = vsub.s32 1, %v185_v17  ;;  %v1295_v20 = vsub.s32 0, %v185_v17  ;;  %v208_v35 = vsub.s32 2, %v185_v17  ;;  %s1222_s8 = smov 96   ;;  %s1223_s11 = smov 16  }
  0x18   :  { %v219_v38 = vsub.s32 3, %v185_v17  ;;  %v1303_v48 = vunpack.c.l.bf16 %v998_v42  ;;  %v1307_v60 = vunpack.c.h.bf16 %v998_v42  ;;  %s1224_s12 = smov 32   ;;  %s1225_s13 = smov 48   ;;  %vm633_vm14 = vcmask 392192  }
  0x19   :  { %1031 = vmatmul.mubr.msk.bf16.vlgmr.msra.gmra.mrb[0].mxu0 %vm44_vm2, %v39_v5  ;;  %v231_v18 = vunpack.c.0.s8 %v230_v16  ;;  %s1226_s18 = smov [#allocation5]  }
  0x1a   :  { %1042 = vmatprep.mubr.msk.bf16.mxu0 %vm1218_vm0, %v1217_v0  ;;  %s965_s19 = sshll.u32 %s1226_s18, 4  ;;  %s966_s19 = int_to_ptr.vmem [resolvable:$true] %s965_s19 }
  0x1b   :  { %v234_v21 = vsub.s32 %v231_v18, %v185_v17  ;;  %s1188_s20 = scalar_lea.vmem %s966_s19, 256  ;;  %p1193_p9 = scmp.lt.s32.totalorder %s966_s19, %s966_s19 }
  0x1c   :  { %p1189_p8 = scmp.ne.s32.totalorder %s966_s19, %s1188_s20  ;;  %p1194_p10 = scmp.lt.s32.totalorder %s1188_s20, %s1188_s20 }
  0x1e   :  { %p1195_p11 = por %p1194_p10, %p1193_p9 }
  0x20   :  { %p1196_p12 = pnand %p1195_p11, %p1189_p8 }
  0xec   :  { %v86_v6 = vpop.f32.mrb[0].mxu0 }
  0xed   :  { %v1032_v7 = vpop.f32.mrb[1].mxu0 }
  0xee   :  { %v89_v8 = vpop.f32.mrb[2].mxu0 }
  0xef   :  { %v1281_v9 = vpack.c.bf16 %v89_v8, %v86_v6  ;;  %v1033_v10 = vpop.f32.mrb[3].mxu0 }
  0xf1   :  { %v99_v11 = vsel %vm94_vm3, %v1281_v9, 0 }
  0xf2   :  { %1035 = vmatpush3.bf16.xpose.msra.mxu1 %v99_v11  ;;  %1041 = vmatpush3.bf16.xpose.msra.mxu0 %v99_v11 }
  0xf3   :  { %1046 = vmatprep.subr.bf16.mxu1 %v1217_v0  ;;  %1052 = vmatprep.subr.bf16.mxu0 %v1217_v0 }
  0xf9   :  { %1043 = vmatmul.mubr.msk.bf16.vlgmr.msra.gmra.mrb[4].mxu0 %vm94_vm3, %v42_v12  ;;  %1037 = vmatmul.mubr.msk.bf16.vlgmr.msra.gmra.mrb[0].mxu1 %vm94_vm3, %v41_v13 }
  0xfa   :  { %1047 = vmatpush3.bf16.msra.mxu1 %v1281_v9  ;;  %1048 = vmatprep.mubr.msk.bf16.mxu1 %vm1218_vm0, %v1217_v0 }
  0xfb   :  { %1058 = vmatprep.subr.bf16.mxu1 %v1217_v0  ;;  %1054 = vmatprep.mubr.msk.bf16.mxu0 %vm1218_vm0, %v1217_v0 }
 0x1cc   :  { %v178_v22 = vpop.f32.mrb[4].mxu0  ;;  %v135_v23 = vpop.f32.mrb[0].mxu1 }
 0x1cd   :  { %v1044_v24 = vpop.f32.mrb[5].mxu0  ;;  %v198_v25 = vrot.slane %v178_v22, %v197_v19  ;;  %v187_v26 = vrot.slane %v178_v22, %v1295_v20  ;;  %v1038_v27 = vpop.f32.mrb[1].mxu1  ;;  %v235_v29 = vrot.slane %v135_v23, %v234_v21  ;;  %v209_v37 = vrot.slane %v178_v22, %v208_v35 }
 0x1ce   :  { %v181_v28 = vpop.f32.mrb[6].mxu0  ;;  %v138_v30 = vpop.f32.mrb[2].mxu1  ;;  %v220_v39 = vrot.slane %v178_v22, %v219_v38 }
 0x1cf   :  { %200 = vbcast.lane.b32.xlu1 %v198_v25, 256  ;;  %189 = vbcast.lane.b32.xlu0 %v187_v26, 256  ;;  %v1045_v31 = vpop.f32.mrb[7].mxu0  ;;  %v1039_v32 = vpop.f32.mrb[3].mxu1  ;;  %v236_v33 = vcombine.high %v235_v29, %v235_v29  ;;  %v243_v34 = vrot.slane %v235_v29, %v234_v21 }
 0x1d1   :  { %v250_v36 = vrot.slane %v236_v33, %v234_v21  ;;  %v256_v41 = vrot.slane %v243_v34, %v1295_v20  ;;  %v251_v47 = vcombine.high %v243_v34, %v243_v34 }
 0x1d3   :  { %204 = vbcast.lane.b32.xlu1 %v198_v25, 264  ;;  %193 = vbcast.lane.b32.xlu0 %v187_v26, 264  ;;  %v260_v40 = vrot.slane %v250_v36, %v1295_v20  ;;  %v264_v57 = vrot.slane %v251_v47, %v1295_v20  ;;  %v252_v59 = vcombine.high %v250_v36, %v250_v36 }
 0x1d5   :  { %v268_v8 = vrot.slane %v252_v59, %v1295_v20 }
 0x1d7   :  { %215 = vbcast.lane.b32.xlu1 %v209_v37, 264  ;;  %211 = vbcast.lane.b32.xlu0 %v209_v37, 256 }
 0x1db   :  { %226 = vbcast.lane.b32.xlu1 %v220_v39, 264  ;;  %222 = vbcast.lane.b32.xlu0 %v220_v39, 256 }
 0x241   :  { %v201_v43 = vpop.permute.xlu1 %200  ;;  %v190_v44 = vpop.permute.xlu0 %189 }
 0x242   :  { %v275_v45 = vadd.f32 %v260_v40, %v201_v43  ;;  %v273_v46 = vadd.f32 %v256_v41, %v190_v44 }
 0x244   :  { %vm283_vm4 = vcmp.gt.f32.partialorder %v275_v45, 0.0  ;;  %v291_v49 = vmul.f32 0.2, %v275_v45  ;;  %vm281_vm5 = vcmp.gt.f32.partialorder %v273_v46, 0.0  ;;  %v289_v50 = vmul.f32 0.2, %v273_v46 }
 0x245   :  { %v205_v51 = vpop.permute.xlu1 %204  ;;  %v194_v52 = vpop.permute.xlu0 %193 }
 0x246   :  { %v276_v53 = vadd.f32 %v260_v40, %v205_v51  ;;  %v274_v54 = vadd.f32 %v256_v41, %v194_v52  ;;  %v297_v55 = vsel %vm281_vm5, %v273_v46, %v289_v50  ;;  %v299_v56 = vsel %vm283_vm4, %v275_v45, %v291_v49 }
 0x247   :  { %v305_v58 = vadd.f32 %v1303_v48, %v297_v55  ;;  %v307_v3 = vadd.f32 %v1303_v48, %v299_v56 }
 0x248   :  { %vm284_vm7 = vcmp.gt.f32.partialorder %v276_v53, 0.0  ;;  %v292_v61 = vmul.f32 0.2, %v276_v53  ;;  %vm282_vm8 = vcmp.gt.f32.partialorder %v274_v54, 0.0  ;;  %v290_v62 = vmul.f32 0.2, %v274_v54 }
 0x249   :  { %v216_v63 = vpop.permute.xlu1 %215  ;;  %v212_v1 = vpop.permute.xlu0 %211  ;;  %v314_v2 = vsel %vm313_vm6, %v305_v58, -inf  ;;  %v320_v16 = vsel %vm313_vm6, %v307_v3, -inf }
 0x24a   :  { %v278_v4 = vadd.f32 %v264_v57, %v216_v63  ;;  %v277_v5 = vadd.f32 %v264_v57, %v212_v1  ;;  %315 = vmax.xlane.f32.xlu0 %v314_v2  ;;  %v298_v6 = vsel %vm282_vm8, %v274_v54, %v290_v62  ;;  %v300_v7 = vsel %vm284_vm7, %v276_v53, %v292_v61 }
 0x24b   :  { %v306_v10 = vadd.f32 %v1307_v60, %v298_v6  ;;  %v308_v17 = vadd.f32 %v1307_v60, %v300_v7 }
 0x24c   :  { %vm286_vm9 = vcmp.gt.f32.partialorder %v278_v4, 0.0  ;;  %v294_v11 = vmul.f32 0.2, %v278_v4  ;;  %vm285_vm10 = vcmp.gt.f32.partialorder %v277_v5, 0.0  ;;  %v293_v12 = vmul.f32 0.2, %v277_v5 }
 0x24d   :  { %v227_v13 = vpop.permute.xlu1 %226  ;;  %v223_v14 = vpop.permute.xlu0 %222  ;;  %v317_v15 = vsel %vm313_vm6, %v306_v10, -inf  ;;  %v323_v27 = vsel %vm313_vm6, %v308_v17, -inf }
 0x24e   :  { %v280_v18 = vadd.f32 %v268_v8, %v227_v13  ;;  %v279_v19 = vadd.f32 %v268_v8, %v223_v14  ;;  %318 = vmax.xlane.f32.xlu1 %v317_v15  ;;  %321 = vmax.xlane.f32.xlu0 %v320_v16  ;;  %v301_v21 = vsel %vm285_vm10, %v277_v5, %v293_v12 }
 0x24f   :  { %v309_v22 = vadd.f32 %v1303_v48, %v301_v21  ;;  %v302_v23 = vsel %vm286_vm9, %v278_v4, %v294_v11 }
 0x250   :  { %vm288_vm11 = vcmp.gt.f32.partialorder %v280_v18, 0.0  ;;  %v296_v24 = vmul.f32 0.2, %v280_v18  ;;  %vm287_vm12 = vcmp.gt.f32.partialorder %v279_v19, 0.0  ;;  %v295_v25 = vmul.f32 0.2, %v279_v19 }
 0x251   :  { %v326_v26 = vsel %vm313_vm6, %v309_v22, -inf  ;;  %v310_v28 = vadd.f32 %v1307_v60, %v302_v23 }
 0x252   :  { %327 = vmax.xlane.f32.xlu1 %v326_v26  ;;  %324 = vmax.xlane.f32.xlu0 %v323_v27  ;;  %v303_v29 = vsel %vm287_vm12, %v279_v19, %v295_v25  ;;  %v304_v30 = vsel %vm288_vm11, %v280_v18, %v296_v24 }
 0x253   :  { %v311_v31 = vadd.f32 %v1303_v48, %v303_v29  ;;  %v329_v33 = vsel %vm313_vm6, %v310_v28, -inf  ;;  %v312_v34 = vadd.f32 %v1307_v60, %v304_v30 }
 0x255   :  { %v332_v32 = vsel %vm313_vm6, %v311_v31, -inf  ;;  %v335_v35 = vsel %vm313_vm6, %v312_v34, -inf }
 0x256   :  { %333 = vmax.xlane.f32.xlu1 %v332_v32  ;;  %330 = vmax.xlane.f32.xlu0 %v329_v33 }
 0x25a   :  { %336 = vmax.xlane.f32.xlu0 %v335_v35 }
 0x267   :  { %458 = vrot.lane.b32.xlu1 %v1281_v9, %s1220_s1 }
 0x2d7   :  { %v316_v36 = vpop.xlane.xlu0 %315 }
 0x2d8   :  { %v338_v37 = vsub.f32 %v305_v58, %v316_v36 }
 0x2da   :  { %v346_v38 = vmul.f32 1.442695, %v338_v37 }
 0x2db   :  { %v319_v39 = vpop.xlane.xlu1 %318  ;;  %v322_v40 = vpop.xlane.xlu0 %321 }
 0x2dc   :  { %1126 = vpow2.f32 %v346_v38  ;;  %v339_v41 = vsub.f32 %v306_v10, %v319_v39  ;;  %v340_v42 = vsub.f32 %v307_v3, %v322_v40 }
 0x2de   :  { %v348_v43 = vmul.f32 1.442695, %v339_v41  ;;  %v350_v44 = vmul.f32 1.442695, %v340_v42 }
 0x2df   :  { %v328_v45 = vpop.xlane.xlu1 %327  ;;  %v325_v46 = vpop.xlane.xlu0 %324 }
 0x2e0   :  { %1128 = vpow2.f32 %v348_v43  ;;  %v342_v47 = vsub.f32 %v309_v22, %v328_v45  ;;  %v341_v49 = vsub.f32 %v308_v17, %v325_v46  ;;  %v1341_v17 = vld [vmem:[%s1411_s3] ss:$0 sm:$0xff] }
 0x2e1   :  { %1130 = vpow2.f32 %v350_v44 }
 0x2e2   :  { %v354_v50 = vmul.f32 1.442695, %v342_v47  ;;  %v352_v51 = vmul.f32 1.442695, %v341_v49  ;;  %v1121_v49 = vld [vmem:[#allocation2 + $0xc] sm:$0xff]  }
 0x2e3   :  { %v334_v52 = vpop.xlane.xlu1 %333  ;;  %v331_v53 = vpop.xlane.xlu0 %330 }
 0x2e4   :  { %1132 = vpow2.f32 %v354_v50  ;;  %v344_v54 = vsub.f32 %v311_v31, %v334_v52  ;;  %v343_v55 = vsub.f32 %v310_v28, %v331_v53  ;;  %v1122_v50 = vld [vmem:[#allocation2 + $0x14] sm:$0xff]  }
 0x2e5   :  { %1134 = vpow2.f32 %v352_v51 }
 0x2e6   :  { %v1127_v56 = vpop.eup %1126  ;;  %v358_v57 = vmul.f32 1.442695, %v344_v54  ;;  %v356_v58 = vmul.f32 1.442695, %v343_v55  ;;  %v1123_v55 = vld [vmem:[#allocation2 + $0x1c] sm:$0xff]  }
 0x2e7   :  { %v459_v59 = vpop.permute.xlu1 %458  ;;  %v337_v61 = vpop.xlane.xlu0 %336  ;;  %v362_v62 = vsel %vm313_vm6, %v1127_v56, 0.0 }
 0x2e8   :  { %1136 = vpow2.f32 %v358_v57  ;;  %v345_v63 = vsub.f32 %v312_v34, %v337_v61  ;;  %1053 = vmatpush3.bf16.msra.mxu0 %v459_v59  ;;  %363 = vadd.xlane.f32.xlu1 %v362_v62 }
 0x2e9   :  { %1138 = vpow2.f32 %v356_v58  ;;  %1064 = vmatprep.subr.bf16.mxu0 %v1217_v0 }
 0x2ea   :  { %v1129_v1 = vpop.eup %1128  ;;  %v360_v2 = vmul.f32 1.442695, %v345_v63  ;;  %v1124_v63 = vld [vmem:[#allocation2 + $0x24] sm:$0xff]  }
 0x2eb   :  { %v1131_v3 = vpop.eup %1130  ;;  %v365_v4 = vsel %vm313_vm6, %v1129_v1, 0.0 }
 0x2ec   :  { %1140 = vpow2.f32 %v360_v2  ;;  %366 = vadd.xlane.f32.xlu0 %v365_v4  ;;  %v368_v5 = vsel %vm313_vm6, %v1131_v3, 0.0 }
 0x2ed   :  { %369 = vadd.xlane.f32.xlu1 %v368_v5 }
 0x2ee   :  { %v1133_v6 = vpop.eup %1132 }
 0x2ef   :  { %v1135_v7 = vpop.eup %1134  ;;  %v374_v8 = vsel %vm313_vm6, %v1133_v6, 0.0 }
 0x2f0   :  { %v371_v10 = vsel %vm313_vm6, %v1135_v7, 0.0 }
 0x2f1   :  { %375 = vadd.xlane.f32.xlu1 %v374_v8  ;;  %372 = vadd.xlane.f32.xlu0 %v371_v10 }
 0x2f2   :  { %v1137_v11 = vpop.eup %1136 }
 0x2f3   :  { %v1139_v12 = vpop.eup %1138  ;;  %v380_v13 = vsel %vm313_vm6, %v1137_v11, 0.0 }
 0x2f4   :  { %v377_v14 = vsel %vm313_vm6, %v1139_v12, 0.0 }
 0x2f5   :  { %381 = vadd.xlane.f32.xlu1 %v380_v13  ;;  %378 = vadd.xlane.f32.xlu0 %v377_v14 }
 0x2f6   :  { %v1141_v15 = vpop.eup %1140 }
 0x2f7   :  { %v383_v16 = vsel %vm313_vm6, %v1141_v15, 0.0 }
 0x2f9   :  { %384 = vadd.xlane.f32.xlu0 %v383_v16 }
 0x306   :  { %565 = vrot.lane.b32.xlu1 %v1281_v9, %s1221_s7 }
 0x30a   :  { %462 = vrot.lane.b32.xlu1 %v1341_v17, %s1220_s1 }
 0x30e   :  { %568 = vrot.lane.b32.xlu1 %v1341_v17, %s1221_s7 }
 0x30f   :  { %512 = vrot.lane.b32.xlu0 %v1281_v9, %s1222_s8 }
 0x313   :  { %515 = vrot.lane.b32.xlu0 %v1341_v17, %s1222_s8 }
 0x375   :  { %v364_v18 = vpop.xlane.xlu1 %363 }
 0x376   :  { %1142 = vrcp.f32 %v364_v18 }
 0x379   :  { %v367_v19 = vpop.xlane.xlu0 %366 }
 0x37a   :  { %v370_v21 = vpop.xlane.xlu1 %369  ;;  %1144 = vrcp.f32 %v367_v19 }
 0x37b   :  { %1146 = vrcp.f32 %v370_v21 }
 0x37e   :  { %v376_v22 = vpop.xlane.xlu1 %375  ;;  %v373_v9 = vpop.xlane.xlu0 %372 }
 0x37f   :  { %1148 = vrcp.f32 %v373_v9 }
 0x380   :  { %v1143_v23 = vpop.eup %1142  ;;  %1150 = vrcp.f32 %v376_v22 }
 0x381   :  { %v394_v27 = vmul.f32 %v1143_v23, %v1127_v56 }
 0x382   :  { %v382_v24 = vpop.xlane.xlu1 %381  ;;  %v379_v25 = vpop.xlane.xlu0 %378 }
 0x383   :  { %1152 = vrcp.f32 %v379_v25 }
 0x384   :  { %v1145_v26 = vpop.eup %1144  ;;  %1154 = vrcp.f32 %v382_v24 }
 0x385   :  { %v395_v28 = vmul.f32 %v1145_v26, %v1129_v1  ;;  %v1147_v31 = vpop.eup %1146 }
 0x386   :  { %v385_v29 = vpop.xlane.xlu0 %384  ;;  %v396_v34 = vmul.f32 %v1147_v31, %v1131_v3  ;;  %v566_v42 = vpop.permute.xlu1 %565 }
 0x387   :  { %1156 = vrcp.f32 %v385_v29  ;;  %v402_v30 = vpack.c.bf16 %v395_v28, %v394_v27 }
 0x389   :  { %1049 = vmatmul.mubr.msk.bf16.vlgmr.msra.gmra.mrb[4].mxu1 %vm313_vm6, %v402_v30  ;;  %v1149_v32 = vpop.eup %1148 }
 0x38a   :  { %v513_v33 = vpop.permute.xlu0 %512  ;;  %1060 = vmatprep.mubr.msk.bf16.mxu1 %vm1218_vm0, %v1217_v0  ;;  %v397_v35 = vmul.f32 %v1149_v32, %v1135_v7  ;;  %v1151_v36 = vpop.eup %1150 }
 0x38b   :  { %1059 = vmatpush3.bf16.msra.mxu1 %v513_v33  ;;  %v398_v40 = vmul.f32 %v1151_v36, %v1133_v6  ;;  %v463_v58 = vpop.permute.xlu1 %462 }
 0x38c   :  { %1070 = vmatprep.subr.bf16.mxu1 %v1217_v0  ;;  %v403_v37 = vpack.c.bf16 %v397_v35, %v396_v34 }
 0x38d   :  { %v1153_v38 = vpop.eup %1152 }
 0x38e   :  { %v1155_v39 = vpop.eup %1154  ;;  %v399_v41 = vmul.f32 %v1153_v38, %v1139_v12  ;;  %1055 = vmatmul.mubr.msk.bf16.vlgmr.msra.gmra.mrb[8].mxu0 %vm313_vm6, %v403_v37  ;;  %v516_v5 = vpop.permute.xlu0 %515 }
 0x38f   :  { %1065 = vmatpush3.bf16.msra.mxu0 %v566_v42  ;;  %1066 = vmatprep.mubr.msk.bf16.mxu0 %vm1218_vm0, %v1217_v0  ;;  %v400_v45 = vmul.f32 %v1155_v39, %v1137_v11 }
 0x390   :  { %v404_v44 = vpack.c.bf16 %v399_v41, %v398_v40  ;;  %1082 = vmatprep.subr.bf16.mxu0 %v1217_v0 }
 0x391   :  { %v1157_v43 = vpop.eup %1156 }
 0x392   :  { %v401_v46 = vmul.f32 %v1157_v43, %v1141_v15  ;;  %1061 = vmatmul.mubr.msk.bf16.vlgmr.msra.gmra.mrb[8].mxu1 %vm313_vm6, %v404_v44  ;;  %v569_v15 = vpop.permute.xlu1 %568  ;;  %v644_v43 = vld [vmem:[#allocation2 + $0x2c] sm:$0x1]  ;;  %v645_v44 = vld [vmem:[#allocation2 + $0x30] sm:$0x1] }
 0x393   :  { %1078 = vmatprep.mubr.msk.bf16.mxu1 %vm1218_vm0, %v1217_v0  ;;  %1071 = vmatpush3.bf16.msra.mxu1 %v1121_v49 }
 0x394   :  { %v405_v47 = vpack.c.bf16 %v401_v46, %v400_v45  ;;  %1072 = vmatprep.subr.bf16.mxu1 %v1217_v0 }
 0x396   :  { %1067 = vmatmul.mubr.msk.bf16.vlgmr.msra.gmra.mrb[12].mxu0 %vm313_vm6, %v405_v47 }
 0x397   :  { %1084 = vmatprep.mubr.msk.bf16.mxu0 %vm1218_vm0, %v1217_v0  ;;  %1073 = vmatpush3.bf16.msra.mxu1 %v1122_v50 }
 0x398   :  { %1074 = vmatprep.subr.bf16.mxu1 %v1217_v0 }
 0x39b   :  { %1075 = vmatpush3.bf16.msra.mxu1 %v1123_v55 }
 0x39c   :  { %1076 = vmatprep.subr.bf16.mxu1 %v1217_v0 }
 0x39f   :  { %1077 = vmatpush3.bf16.msra.mxu1 %v1124_v63 }
 0x3a0   :  { %1094 = vmatprep.subr.bf16.mxu1 %v1217_v0 }
 0x45c   :  { %v447_v51 = vpop.f32.mrb[4].mxu1 }
 0x45d   :  { %v448_v52 = vadd.f32 %v1341_v17, %v447_v51  ;;  %v1050_v53 = vpop.f32.mrb[5].mxu1 }
 0x45e   :  { %v450_v54 = vpop.f32.mrb[6].mxu1 }
 0x45f   :  { %v451_v56 = vadd.f32 %v1341_v17, %v450_v54  ;;  %v1051_v57 = vpop.f32.mrb[7].mxu1  ;;  %v454_v59 = vmax.f32 %v448_v52, 0.0 }
 0x461   :  { %v455_v61 = vmax.f32 %v451_v56, 0.0  ;;  %v502_v62 = vpop.f32.mrb[8].mxu0 }
 0x462   :  { %v503_v2 = vadd.f32 %v502_v62, %v463_v58  ;;  %v1056_v3 = vpop.f32.mrb[9].mxu0 }
 0x463   :  { %v456_v1 = vpack.c.bf16 %v455_v61, %v454_v59  ;;  %v505_v4 = vpop.f32.mrb[10].mxu0 }
 0x464   :  { %v506_v6 = vadd.f32 %v505_v4, %v463_v58  ;;  %v1057_v7 = vpop.f32.mrb[11].mxu0  ;;  %v509_v10 = vmax.f32 %v503_v2, 0.0 }
 0x465   :  { %v555_v8 = vpop.f32.mrb[8].mxu1 }
 0x466   :  { %v510_v11 = vmax.f32 %v506_v6, 0.0  ;;  %v556_v12 = vadd.f32 %v555_v8, %v516_v5  ;;  %v1062_v13 = vpop.f32.mrb[9].mxu1 }
 0x467   :  { %v558_v14 = vpop.f32.mrb[10].mxu1 }
 0x468   :  { %v511_v16 = vpack.c.bf16 %v510_v11, %v509_v10  ;;  %v559_v17 = vadd.f32 %v558_v14, %v516_v5  ;;  %v1063_v18 = vpop.f32.mrb[11].mxu1  ;;  %v562_v21 = vmax.f32 %v556_v12, 0.0 }
 0x469   :  { %v608_v19 = vpop.f32.mrb[12].mxu0 }
 0x46a   :  { %v563_v22 = vmax.f32 %v559_v17, 0.0  ;;  %v609_v9 = vadd.f32 %v608_v19, %v569_v15  ;;  %619 = vrot.lane.b32.xlu0 %v511_v16, %s1223_s11  ;;  %v1068_v23 = vpop.f32.mrb[13].mxu0 }
 0x46b   :  { %v611_v24 = vpop.f32.mrb[14].mxu0 }
 0x46c   :  { %v564_v25 = vpack.c.bf16 %v563_v22, %v562_v21  ;;  %v612_v26 = vadd.f32 %v611_v24, %v569_v15  ;;  %v1069_v27 = vpop.f32.mrb[15].mxu0  ;;  %v615_v28 = vmax.f32 %v609_v9, 0.0  ;;  %v1125_v21 = vld [vmem:[#allocation2 + $0x34] sm:$0xff]   ;;  %v992_v22 = vld [vmem:[%s1411_s3 + $0x1] ss:$0 sm:$0xff] }
 0x46e   :  { %v616_v29 = vmax.f32 %v612_v26, 0.0  ;;  %622 = vrot.lane.b32.xlu1 %v564_v25, %s1224_s12 }
 0x470   :  { %v617_v30 = vpack.c.bf16 %v616_v29, %v615_v28  ;;  %v994_v29 = vld [vmem:[%s1411_s3 + $0x2] ss:$0 sm:$0xff] }
 0x472   :  { %625 = vrot.lane.b32.xlu0 %v617_v30, %s1225_s13 }
 0x4dc   :  { %v620_v31 = vpop.permute.xlu0 %619 }
 0x4dd   :  { %v629_v33 = vsel %vm313_vm6, %v456_v1, %v620_v31 }
 0x4e0   :  { %v623_v32 = vpop.permute.xlu1 %622 }
 0x4e1   :  { %v632_v34 = vsel %vm630_vm13, %v629_v33, %v623_v32 }
 0x4e4   :  { %v626_v35 = vpop.permute.xlu0 %625 }
 0x4e5   :  { %v635_v36 = vsel %vm633_vm14, %v632_v34, %v626_v35 }
 0x4e6   :  { %1079 = vmatmul.mubr.msk.bf16.vlgmr.msra.gmra.mrb[12].mxu1 %vm94_vm3, %v635_v36 }
 0x4e7   :  { %1096 = vmatprep.mubr.msk.bf16.mxu1 %vm1218_vm0, %v1217_v0 }
 0x5b9   :  { %v707_v37 = vpop.f32.mrb[12].mxu1 }
 0x5ba   :  { %v1080_v38 = vpop.f32.mrb[13].mxu1 }
 0x5bb   :  { %v710_v39 = vpop.f32.mrb[14].mxu1 }
 0x5bc   :  { %v714_v40 = vpack.c.bf16 %v710_v39, %v707_v37  ;;  %v1081_v41 = vpop.f32.mrb[15].mxu1 }
 0x5be   :  { %v719_v42 = vsel %vm313_vm6, %v714_v40, 0  ;;  %1095 = vmatpush3.bf16.msra.mxu1 %v714_v40 }
 0x5bf   :  { %1083 = vmatpush3.bf16.xpose.msra.mxu0 %v719_v42 }
 0x5c0   :  { %1088 = vmatprep.subr.bf16.mxu0 %v1217_v0 }
 0x5c6   :  { %1085 = vmatmul.mubr.msk.bf16.vlgmr.msra.gmra.mrb[16].mxu0 %vm313_vm6, %v644_v43 }
 0x5c7   :  { %1089 = vmatpush3.bf16.xpose.msra.mxu0 %v719_v42  ;;  %1090 = vmatprep.mubr.msk.bf16.mxu0 %vm1218_vm0, %v1217_v0 }
 0x5c8   :  { %1100 = vmatprep.subr.bf16.mxu0 %v1217_v0 }
 0x5ce   :  { %1091 = vmatmul.mubr.msk.bf16.vlgmr.msra.gmra.mrb[20].mxu0 %vm313_vm6, %v645_v44 }
 0x5cf   :  { %1102 = vmatprep.mubr.msk.bf16.mxu0 %vm1218_vm0, %v1217_v0  ;;  %1101 = vmatpush3.bf16.msra.mxu0 %v1125_v21 }
 0x699   :  { %v755_v45 = vpop.f32.mrb[16].mxu0 }
 0x69a   :  { %v1086_v46 = vpop.f32.mrb[17].mxu0  ;;  %v818_v55 = vrot.slane %v755_v45, %v1295_v20 }
 0x69b   :  { %v758_v47 = vpop.f32.mrb[18].mxu0 }
 0x69c   :  { %v1087_v49 = vpop.f32.mrb[19].mxu0 }
 0x6a1   :  { %v798_v50 = vpop.f32.mrb[20].mxu0 }
 0x6a2   :  { %v807_v51 = vrot.slane %v798_v50, %v1295_v20  ;;  %v1092_v52 = vpop.f32.mrb[21].mxu0 }
 0x6a3   :  { %v801_v53 = vpop.f32.mrb[22].mxu0 }
 0x6a4   :  { %813 = vbcast.lane.b32.xlu0 %v807_v51, 264  ;;  %809 = vbcast.lane.b32.xlu1 %v807_v51, 256  ;;  %v1093_v54 = vpop.f32.mrb[23].mxu0 }
 0x716   :  { %v814_v56 = vpop.permute.xlu0 %813  ;;  %v810_v57 = vpop.permute.xlu1 %809 }
 0x717   :  { %v820_v58 = vadd.f32 %v818_v55, %v814_v56  ;;  %v819_v59 = vadd.f32 %v818_v55, %v810_v57 }
 0x719   :  { %vm822_vm15 = vcmp.gt.f32.partialorder %v820_v58, 0.0  ;;  %v824_v0 = vmul.f32 0.2, %v820_v58  ;;  %vm821_vm0 = vcmp.gt.f32.partialorder %v819_v59, 0.0  ;;  %v823_v61 = vmul.f32 0.2, %v819_v59 }
 0x71b   :  { %v826_v62 = vsel %vm822_vm15, %v820_v58, %v824_v0  ;;  %v825_v63 = vsel %vm821_vm0, %v819_v59, %v823_v61 }
 0x71c   :  { %v828_v1 = vadd.f32 %v1307_v60, %v826_v62  ;;  %v827_v2 = vadd.f32 %v1303_v48, %v825_v63 }
 0x71e   :  { %v832_v3 = vsel %vm313_vm6, %v828_v1, -inf  ;;  %v829_v4 = vsel %vm313_vm6, %v827_v2, -inf }
 0x71f   :  { %833 = vmax.xlane.f32.xlu0 %v832_v3  ;;  %830 = vmax.xlane.f32.xlu1 %v829_v4 }
 0x7ac   :  { %v834_v20 = vpop.xlane.xlu0 %833  ;;  %v831_v5 = vpop.xlane.xlu1 %830 }
 0x7ad   :  { %v836_v6 = vsub.f32 %v828_v1, %v834_v20  ;;  %v835_v7 = vsub.f32 %v827_v2, %v831_v5 }
 0x7af   :  { %v839_v8 = vmul.f32 1.442695, %v836_v6  ;;  %v837_v10 = vmul.f32 1.442695, %v835_v7 }
 0x7b1   :  { %1158 = vpow2.f32 %v839_v8 }
 0x7b2   :  { %1160 = vpow2.f32 %v837_v10 }
 0x7bb   :  { %v1159_v11 = vpop.eup %1158 }
 0x7bc   :  { %v1161_v12 = vpop.eup %1160  ;;  %v844_v60 = vsel %vm313_vm6, %v1159_v11, 0.0 }
 0x7bd   :  { %845 = vadd.xlane.f32.xlu1 %v844_v60  ;;  %v841_v48 = vsel %vm313_vm6, %v1161_v12, 0.0 }
 0x7be   :  { %842 = vadd.xlane.f32.xlu0 %v841_v48 }
 0x84a   :  { %v846_v13 = vpop.xlane.xlu1 %845 }
 0x84b   :  { %v843_v14 = vpop.xlane.xlu0 %842  ;;  %1162 = vrcp.f32 %v846_v13 }
 0x84c   :  { %1164 = vrcp.f32 %v843_v14 }
 0x855   :  { %v1163_v15 = vpop.eup %1162 }
 0x856   :  { %v1165_v16 = vpop.eup %1164  ;;  %v850_v17 = vmul.f32 %v1163_v15, %v1159_v11 }
 0x857   :  { %v849_v18 = vmul.f32 %v1165_v16, %v1161_v12 }
 0x859   :  { %v851_v19 = vpack.c.bf16 %v850_v17, %v849_v18 }
 0x85b   :  { %1097 = vmatmul.mubr.msk.bf16.vlgmr.msra.gmra.mrb[16].mxu1 %vm313_vm6, %v851_v19 }
 0x92e   :  { %v893_v9 = vpop.f32.mrb[16].mxu1 }
 0x92f   :  { %v1098_v23 = vpop.f32.mrb[17].mxu1  ;;  %v894_v25 = vadd.f32 %v992_v22, %v893_v9 }
 0x930   :  { %v896_v24 = vpop.f32.mrb[18].mxu1 }
 0x931   :  { %v897_v26 = vadd.f32 %v992_v22, %v896_v24  ;;  %v1099_v27 = vpop.f32.mrb[19].mxu1 }
 0x933   :  { %v900_v28 = vpack.c.bf16 %v897_v26, %v894_v25 }
 0x935   :  { %1103 = vmatmul.mubr.msk.bf16.vlgmr.msra.gmra.mrb[24].mxu0 %vm313_vm6, %v900_v28 }
 0xa08   :  { %v951_v30 = vpop.f32.mrb[24].mxu0 }
 0xa09   :  { %v952_v31 = vadd.f32 %v994_v29, %v951_v30  ;;  %v1104_v32 = vpop.f32.mrb[25].mxu0 }
 0xa0a   :  { %v954_v33 = vpop.f32.mrb[26].mxu0 }
 0xa0b   :  { %958 = vst [vmem:[#allocation5] sm:$0xff] %v952_v31  ;;  %v955_v34 = vadd.f32 %v994_v29, %v954_v33  ;;  %v1105_v35 = vpop.f32.mrb[27].mxu0 }
 0xa0d   :  { %959 = vst [vmem:[#allocation5 + $0x8] sm:$0xff] %v955_v34 }
 0xa0e   :  { %1199 = shalt.err (!%p1196_p12)
}
 0xa0f   :  { %s1200_s22 = scalar_lea.hbm %s1412_s4, 256 }
 0xa10   :  { %p1201_p13 = scmp.ne.s32.totalorder %s1412_s4, %s1200_s22  ;;  %p1204_p0 = scmp.lt.u32.totalorder %s1200_s22, %s1412_s4 }
 0xa12   :  { %p1206_p1 = pnand %p1204_p0, %p1201_p13 }
 0xa14   :  { %1209 = shalt.err (!%p1206_p1)
}
 0xa15   :  { %s1227_s27 = smov 128   ;;  %s1228_s28 = smov 8  }
 0xa16   :  { %971 = dma.vmem_to_hbm [thread:$0]  %s966_s19, 256, %s1412_s4, [#allocation4], %s1227_s27, %s1227_s27, %s1228_s28  }
 0xa17   :  { %1212 = dma.done.wait [#allocation4], 256  }
 0xa18   :  { %1213 = vsyncadd [#allocation4], 4294967040 }
 0xa19   :  { %975 = vsyncpa [#allocation3], 1 }
 0xa1a   :  { %976 = vsyncpa [#allocation4], 1 }

</bundles_post_ra>
